<compile_context>
chip_gen: v7x
topology: tpu7x:2x2x1
jax: 0.10.0
libtpu: 0.0.40
codegen_flags: <defaults>
</compile_context>

<pallas_src>
import functools

import jax
import jax.numpy as jnp
from jax.experimental import pallas as pl
from jax.experimental.pallas import tpu as pltpu


def _pow_const(x, p):
    """x ** p for a compile-time constant p.

    Integer p in [1, 16] uses exponentiation-by-squaring (pure VALU
    multiplies); anything else falls back to jnp.power (EUP exp+log).
    """
    pf = float(p)
    if pf.is_integer() and 1 <= int(pf) <= 16:
        n = int(pf)
        result = None
        base = x
        while n:
            if n & 1:
                result = base if result is None else result * base
            n >>= 1
            if n:
                base = base * base
        return result
    return jnp.power(x, pf)


def _gem_kernel(x_ref, o_ref, acc_ref, *, p, inv_p, eps, hw_total):
    # x_ref:   (TN, HW_CHUNK) input tile in VMEM
    # o_ref:   (TN, 1) output tile (same block index across the HW axis)
    # acc_ref: (TN, 1) f32 running sum of clamp(x, eps)**p
    k = pl.program_id(1)

    @pl.when(k == 0)
    def _():
        acc_ref[...] = jnp.zeros_like(acc_ref)

    x = x_ref[...].astype(jnp.float32)
    x = jnp.maximum(x, eps)                         # clamp(min=eps)
    xp = _pow_const(x, p)                           # x ** p  (VALU for int p)
    acc_ref[...] += jnp.sum(xp, axis=-1, keepdims=True)

    @pl.when(k == pl.num_programs(1) - 1)
    def _():
        m = acc_ref[...] * (1.0 / hw_total)         # mean over the full H*W
        y = jnp.power(m, inv_p)                     # ** (1/p), once per row
        o_ref[...] = y.astype(o_ref.dtype)


def _choose_tiles(N, HW, itemsize):
    """Pick (row_tile, hw_chunk) that fit comfortably in VMEM on v5e/v6e/v7x."""
    # --- HW chunk (reduction axis). Must be a multiple of 128 or the full
    #     extent; only chunk when HW divides evenly so no padded lanes ever
    #     contribute to the accumulated sum.
    max_hw_chunk = 2048
    if HW <= max_hw_chunk or HW % 128 != 0:
        hw_chunk = HW
    else:
        hw_chunk = HW
        for c in range(max_hw_chunk, 0, -128):
            if HW % c == 0:
                hw_chunk = c
                break

    # --- Row tile over N = B*C.  ~2 MiB of input per block: double-buffered
    #     input (~4 MiB) plus the f32 upcast / x**p intermediates stays far
    #     below the 16 MiB scoped-VMEM default (v5e) and inside v7x's 64 MiB.
    budget_bytes = 2 * 1024 * 1024
    tn = max(8, budget_bytes // max(1, hw_chunk * itemsize))
    tn = min(tn, 1024)
    tn = (tn // 8) * 8           # second-to-last block dim must be 8-aligned
    if tn >= N:
        tn = N                   # full extent is always a legal block size
    return tn, hw_chunk


def gem_pool(x, p=3.0, eps=1e-6):
    """x: (B, C, H, W) NCHW. Returns (B, C, 1, 1), matching PyTorch GeM."""
    B, C, H, W = x.shape
    N, HW = B * C, H * W
    x2d = x.reshape(N, HW)

    tn, hw_chunk = _choose_tiles(N, HW, x2d.dtype.itemsize)
    grid = (pl.cdiv(N, tn), pl.cdiv(HW, hw_chunk))

    kernel = functools.partial(
        _gem_kernel,
        p=float(p),
        inv_p=1.0 / float(p),
        eps=float(eps),
        hw_total=float(HW),
    )

    out2d = pl.pallas_call(
        kernel,
        out_shape=jax.ShapeDtypeStruct((N, 1), x.dtype),
        grid_spec=pltpu.PrefetchScalarGridSpec(
            num_scalar_prefetch=0,
            grid=grid,
            in_specs=[pl.BlockSpec((tn, hw_chunk), lambda i, k: (i, k))],
            out_specs=pl.BlockSpec((tn, 1), lambda i, k: (i, 0)),
            scratch_shapes=[pltpu.VMEM((tn, 1), jnp.float32)],
        ),
        compiler_params=pltpu.CompilerParams(
            # N tiles are independent (parallel -> megacore sharding on v7x);
            # HW is the reduction axis, placed last, "arbitrary".
            dimension_semantics=("parallel", "arbitrary"),
        ),
    )(x2d)

    return out2d.reshape(B, C, 1, 1)


def _gem_ref(x, p, eps):
    """Pure-JAX reference (same math as the PyTorch module)."""
    clamped = jnp.maximum(x, eps)
    return jnp.power(
        jnp.mean(jnp.power(clamped, p), axis=(2, 3), keepdims=True),
        1.0 / p,
    )


if __name__ == "__main__":
    key = jax.random.PRNGKey(0)
    p, eps = 3.0, 1e-6

    # Cases: small baseline; non-multiple-of-8 N with odd HW (ragged-tile
    # path); larger HW that exercises the blocked HW reduction (grid k > 1).
    cases = [
        (2, 4, 16, 16),
        (5, 4, 7, 9),
        (1, 8, 64, 64),
    ]

    for idx, (B, C, H, W) in enumerate(cases):
        k = jax.random.fold_in(key, idx)
        x = jax.random.normal(k, (B, C, H, W), dtype=jnp.float32)

        out = gem_pool(x, p=p, eps=eps)
        out = jax.block_until_ready(out)

        ref = _gem_ref(x, p, eps)
        assert out.shape == (B, C, 1, 1), out.shape
        assert jnp.allclose(out, ref, atol=1e-5, rtol=1e-4), (
            (B, C, H, W),
            float(jnp.max(jnp.abs(out - ref))),
        )

    print("KERNEL_OK")
</pallas_src>

<mosaic_0001>
module attributes {stable_mosaic.version = 11 : i64} {
  func.func @_gem_kernel(%arg0: i32, %arg1: i32, %arg2: memref<8x256xf32, #tpu.memory_space<vmem>>, %arg3: memref<8x1xf32, #tpu.memory_space<vmem>>, %arg4: memref<8x1xf32, #tpu.memory_space<vmem>>) attributes {dimension_semantics = [#tpu.dimension_semantics<parallel>, #tpu.dimension_semantics<arbitrary>], iteration_bounds = array<i64: 1, 1>, scalar_prefetch = 0 : i64, scratch_operands = 1 : i64, tpu.core_type = #tpu.core_type<tc>, window_params = [{transform_indices = @transform_0, window_bounds = array<i64: 8, 256>}, {transform_indices = @transform_1, window_bounds = array<i64: 8, 1>}]} {
    %c0_i32 = arith.constant 0 : i32
    %0 = arith.cmpi eq, %arg1, %c0_i32 : i32
    %1 = arith.extui %0 : i1 to i32
    %c0_i32_0 = arith.constant 0 : i32
    %2 = arith.cmpi ne, %1, %c0_i32_0 : i32
    scf.if %2 {
      %cst_9 = arith.constant 0.000000e+00 : f32
      %16 = vector.broadcast %cst_9 : f32 to vector<8x1xf32>
      %c0_10 = arith.constant 0 : index
      %c0_11 = arith.constant 0 : index
      %17 = vector.load %arg4[%c0_10, %c0_11] : memref<8x1xf32, #tpu.memory_space<vmem>>, vector<8x1xf32>
      tpu.vector_store %arg4[%c0_10, %c0_11], %16 {strides = array<i32>} : memref<8x1xf32, #tpu.memory_space<vmem>>, vector<8x1xf32>,
    } else {
    }
    %c0 = arith.constant 0 : index
    %c0_1 = arith.constant 0 : index
    %3 = vector.load %arg2[%c0, %c0_1] : memref<8x256xf32, #tpu.memory_space<vmem>>, vector<8x256xf32>
    %cst = arith.constant 9.99999997E-7 : f32
    %4 = vector.broadcast %cst : f32 to vector<8x256xf32>
    %5 = arith.maximumf %3, %4 : vector<8x256xf32>
    %6 = arith.mulf %5, %5 : vector<8x256xf32>
    %7 = arith.mulf %5, %6 : vector<8x256xf32>
    %c0_2 = arith.constant 0 : index
    %c0_3 = arith.constant 0 : index
    %8 = vector.load %arg4[%c0_2, %c0_3] : memref<8x1xf32, #tpu.memory_space<vmem>>, vector<8x1xf32>
    %cst_4 = arith.constant dense<0.000000e+00> : vector<8xf32>
    %9 = vector.multi_reduction <add>, %7, %cst_4 [1] : vector<8x256xf32> to vector<8xf32>
    %10 = vector.shape_cast %9 : vector<8xf32> to vector<8x1xf32>
    %11 = arith.addf %8, %10 : vector<8x1xf32>
    %c0_5 = arith.constant 0 : index
    %c0_6 = arith.constant 0 : index
    %12 = vector.load %arg4[%c0_5, %c0_6] : memref<8x1xf32, #tpu.memory_space<vmem>>, vector<8x1xf32>
    tpu.vector_store %arg4[%c0_5, %c0_6], %11 {strides = array<i32>} : memref<8x1xf32, #tpu.memory_space<vmem>>, vector<8x1xf32>,
    %c0_i32_7 = arith.constant 0 : i32
    %13 = arith.cmpi eq, %arg1, %c0_i32_7 : i32
    %14 = arith.extui %13 : i1 to i32
    %c0_i32_8 = arith.constant 0 : i32
    %15 = arith.cmpi ne, %14, %c0_i32_8 : i32
    scf.if %15 {
      %c0_9 = arith.constant 0 : index
      %c0_10 = arith.constant 0 : index
      %16 = vector.load %arg4[%c0_9, %c0_10] : memref<8x1xf32, #tpu.memory_space<vmem>>, vector<8x1xf32>
      %cst_11 = arith.constant 3.906250e-03 : f32
      %17 = vector.broadcast %cst_11 : f32 to vector<8x1xf32>
      %18 = arith.mulf %16, %17 : vector<8x1xf32>
      %cst_12 = arith.constant 0.333333343 : f32
      %19 = vector.broadcast %cst_12 : f32 to vector<8x1xf32>
      %20 = math.powf %18, %19 : vector<8x1xf32>
      %c0_13 = arith.constant 0 : index
      %c0_14 = arith.constant 0 : index
      %21 = vector.load %arg3[%c0_13, %c0_14] : memref<8x1xf32, #tpu.memory_space<vmem>>, vector<8x1xf32>
      tpu.vector_store %arg3[%c0_13, %c0_14], %20 {strides = array<i32>} : memref<8x1xf32, #tpu.memory_space<vmem>>, vector<8x1xf32>,
    } else {
    }
    return
  }
  func.func @transform_0(%arg0: i32, %arg1: i32) -> (i32, i32) {
    %c0_i32 = arith.constant 0 : i32
    return %arg0, %arg1 : i32, i32
  }
  func.func @transform_1(%arg0: i32, %arg1: i32) -> (i32, i32) {
    %c0_i32 = arith.constant 0 : i32
    %c0_i32_0 = arith.constant 0 : i32
    return %arg0, %c0_i32 : i32, i32
  }
}

</mosaic_0001>

<bundles_post_ra>
// kernel: tpu_custom_call.1
= control target key start
LH: loop header
LB: loop body
LE: loop exit
PB: predicated region body
PF: predicated region fallthrough
CT: control target
= control target key end

     0   :  { %6 = vsyncpa [#allocation4], 0  ;;  %s101_s6 = smov [#allocation3]   ;;  %s131_s0 = inlined_call_operand.hbm [shape: f32[8,256], index: 0, kind: input, shape index: {}]   ;;  %s132_s1 = inlined_call_operand.vmem [shape: f32[8,1], index: 1, kind: output, shape index: {}]  }
   0x1   :  { %s13_s7 = sshll.u32 %s101_s6, 4  ;;  %s77_s10 = scalar_lea.hbm %s131_s0, 256  ;;  %s14_s7 = int_to_ptr.vmem [resolvable:$true] %s13_s7 }
   0x2   :  { %p78_p0 = scmp.ne.s32.totalorder %s131_s0, %s77_s10  ;;  %p81_p1 = scmp.lt.u32.totalorder %s77_s10, %s131_s0 }
   0x4   :  { %p83_p2 = pnand %p81_p1, %p78_p0 }
   0x6   :  { %86 = shalt.err (!%p83_p2)
}
   0x7   :  { %s87_s15 = scalar_lea.vmem %s14_s7, 256  ;;  %p92_p4 = scmp.lt.s32.totalorder %s14_s7, %s14_s7 }
   0x8   :  { %p88_p3 = scmp.ne.s32.totalorder %s14_s7, %s87_s15  ;;  %p93_p5 = scmp.lt.s32.totalorder %s87_s15, %s87_s15 }
   0xa   :  { %p94_p6 = por %p93_p5, %p92_p4 }
   0xc   :  { %p95_p7 = pnand %p94_p6, %p88_p3 }
   0xe   :  { %98 = shalt.err (!%p95_p7)
}
   0xf   :  { %16 = dma.hbm_to_vmem [thread:$0]  %s131_s0, 256, %s14_s7, [#allocation4]  }
  0x10   :  { %99 = dma.done.wait [#allocation4], 256  }
  0x11   :  { %100 = vsyncadd [#allocation4], 4294967040  ;;  %vm24_vm0 = vcmask 7168   ;;  %v102_v0 = vmov 0.0   ;;  %v26_v1 = vld [vmem:[#allocation3] sm:$0xff]  ;;  %v27_v2 = vld [vmem:[#allocation3 + $0x8] sm:$0xff] }
  0x12   :  { %25 = vst.msk [vmem:[#allocation2] sm:$0xff] %vm24_vm0, %v102_v0  ;;  %v28_v3 = vmax.f32 %v26_v1, 1e-06  ;;  %v29_v4 = vmax.f32 %v27_v2, 1e-06 }
  0x14   :  { %v30_v5 = vmul.f32 %v28_v3, %v28_v3  ;;  %v31_v6 = vmul.f32 %v29_v4, %v29_v4 }
  0x16   :  { %v32_v7 = vmul.f32 %v30_v5, %v28_v3  ;;  %v33_v8 = vmul.f32 %v31_v6, %v29_v4 }
  0x18   :  { %v35_v9 = vadd.f32 %v33_v8, %v32_v7 }
  0x19   :  { %v34_v10 = vld [vmem:[#allocation2] sm:$0xff] }
  0x1a   :  { %36 = vadd.xlane.f32.xlu0 %v35_v9 }
  0xa7   :  { %v37_v11 = vpop.xlane.xlu0 %36 }
  0xa8   :  { %v38_v12 = vadd.f32 %v37_v11, %v34_v10 }
  0xaa   :  { %40 = vst.msk [vmem:[#allocation2] sm:$0xff] %vm24_vm0, %v38_v12 }
  0xb1   :  { %v44_v13 = vld [vmem:[#allocation2] sm:$0xff] }
  0xb2   :  { %v45_v14 = vmul.f32 0.00390625, %v44_v13 }
  0xb4   :  { %v55_v15 = vand.u32 2147483647, %v45_v14  ;;  %v59_v18 = vand.u32 2147483648, %v45_v14  ;;  %vm54_vm3 = vcmp.lt.f32.partialorder %v45_v14, 0.0  ;;  %vm53_vm4 = vcmp.eq.f32.partialorder %v45_v14, 0.0 }
  0xb6   :  { %73 = vlog2.f32 %v55_v15  ;;  %vm63_vm1 = vweird.f32 %v55_v15  ;;  %vm65_vm2 = vcmp.eq.f32.partialorder %v55_v15, 0.0  ;;  %vm56_vm5 = vcmp.eq.f32.partialorder %v55_v15, inf }
  0xc0   :  { %v74_v16 = vpop.eup %73 }
  0xc1   :  { %v60_v17 = vmul.f32 0.33333334, %v74_v16 }
  0xc3   :  { %75 = vpow2.f32 %v60_v17 }
  0xcd   :  { %v76_v19 = vpop.eup %75 }
  0xce   :  { %v62_v20 = vor.u32 %v76_v19, %v59_v18 }
  0xd0   :  { %v64_v21 = vsel %vm63_vm1, %v45_v14, %v62_v20 }
  0xd1   :  { %v67_v22 = vsel %vm65_vm2, %v59_v18, %v64_v21 }
  0xd2   :  { %v68_v23 = vsel %vm54_vm3, nan, %v67_v22 }
  0xd3   :  { %v69_v24 = vsel %vm53_vm4, 0.0, %v68_v23 }
  0xd4   :  { %v70_v25 = vsel %vm56_vm5, inf, %v69_v24 }
  0xd5   :  { %47 = vst.msk [vmem:[%s132_s1] sm:$0xff] %vm24_vm0, %v70_v25 }
  0xd6   :  { %52 = vsyncpa [#allocation4], 1 }

</bundles_post_ra>
